<compile_context>
chip_gen: v5e
topology: v5e:2x2
jax: 0.10.0
libtpu: 0.0.40
codegen_flags: <defaults>
</compile_context>

<pallas_src>
from functools import partial

import jax
import jax.numpy as jnp
from jax.experimental import pallas as pl
from jax.experimental.pallas import tpu as pltpu

LANE = 128      # padded width for input / hidden / output features
N_LAYERS = 4


def mlp_kernel(x_ref, w_ref, b_ref, o_ref):
    # x_ref: (TB, 128) bf16
    # w_ref: (4, 128, 128) bf16   (VMEM-resident across all batch tiles)
    # b_ref: (4, 128)      f32
    h = x_ref[...]

    # Layers 1..3: Linear + ReLU (static unrolled loop -> 3 MXU passes)
    for l in range(N_LAYERS - 1):
        h = jnp.dot(h, w_ref[l], preferred_element_type=jnp.float32)
        h = h + b_ref[l:l + 1, :]
        h = jnp.maximum(h, 0.0).astype(jnp.bfloat16)

    # Layer 4: Linear, then sigmoid - 0.4 (lane-dense 128-wide f32 store)
    logits = jnp.dot(h, w_ref[N_LAYERS - 1], preferred_element_type=jnp.float32)
    logits = logits + b_ref[N_LAYERS - 1:N_LAYERS, :]
    o_ref[...] = jax.nn.sigmoid(logits) - 0.4


def _pad_to(a, shape):
    pads = [(0, t - s) for s, t in zip(a.shape, shape)]
    return jnp.pad(a, pads)


@partial(jax.jit, static_argnames=("tb",))
def neural_network_modular(x, params, *, tb=512):
    """x: (B, input_size) f32; params: list of (W, b), W (in, out), b (1, out)."""
    B, _ = x.shape
    out_size = params[-1][0].shape[1]

    # Batch tile: multiple of 8 sublanes, capped at `tb` rows; pad B up to a
    # whole number of tiles.
    b_pad = max(8, ((B + 7) // 8) * 8)
    TB = min(tb, b_pad)
    b_pad = ((b_pad + TB - 1) // TB) * TB
    n_blocks = b_pad // TB

    # Zero-pad everything to 128 lanes; bf16 operands for the MXU, f32 biases.
    xp = _pad_to(x, (b_pad, LANE)).astype(jnp.bfloat16)
    w_stack = jnp.stack(
        [_pad_to(w, (LANE, LANE)).astype(jnp.bfloat16) for w, _ in params])   # (4,128,128)
    b_stack = jnp.stack(
        [_pad_to(b.reshape(-1), (LANE,)).astype(jnp.float32) for _, b in params])  # (4,128)

    out_padded = pl.pallas_call(
        mlp_kernel,
        out_shape=jax.ShapeDtypeStruct((b_pad, LANE), jnp.float32),
        grid=(n_blocks,),
        in_specs=[
            pl.BlockSpec((TB, LANE), lambda i: (i, 0)),                 # x: tiled over batch
            pl.BlockSpec((N_LAYERS, LANE, LANE), lambda i: (0, 0, 0)),  # weights: resident
            pl.BlockSpec((N_LAYERS, LANE), lambda i: (0, 0)),           # biases: resident
        ],
        out_specs=pl.BlockSpec((TB, LANE), lambda i: (i, 0)),
        compiler_params=pltpu.CompilerParams(
            dimension_semantics=("parallel",),   # shards batch tiles across TCs on v7x
            vmem_limit_bytes=64 * 1024 * 1024,
        ),
    )(xp, w_stack, b_stack)

    return out_padded[:B, :out_size]


def init_linear(key, in_features, out_features):
    """Deterministic init mimicking torch.nn.Linear (uniform +/- 1/sqrt(in))."""
    kw, kb = jax.random.split(key)
    bound = 1.0 / jnp.sqrt(jnp.float32(in_features))
    w = jax.random.uniform(kw, (in_features, out_features), jnp.float32,
                           minval=-bound, maxval=bound)   # stored (in, out): x @ W
    b = jax.random.uniform(kb, (1, out_features), jnp.float32,
                           minval=-bound, maxval=bound)
    return w, b


def _reference_f32(x, params):
    h = x
    for i, (w, b) in enumerate(params):
        h = h @ w + b
        if i < len(params) - 1:
            h = jnp.maximum(h, 0.0)
    return jax.nn.sigmoid(h) - 0.4


def _reference_bf16(x, params):
    """Same math as the kernel (padded bf16 operands, f32 accumulate)."""
    out_size = params[-1][0].shape[1]
    h = _pad_to(x, (x.shape[0], LANE)).astype(jnp.bfloat16)
    for i, (w, b) in enumerate(params):
        wp = _pad_to(w, (LANE, LANE)).astype(jnp.bfloat16)
        bp = _pad_to(b.reshape(1, -1), (1, LANE)).astype(jnp.float32)
        h = jnp.dot(h, wp, preferred_element_type=jnp.float32) + bp
        if i < len(params) - 1:
            h = jnp.maximum(h, 0.0).astype(jnp.bfloat16)
    return (jax.nn.sigmoid(h) - 0.4)[:, :out_size]


if __name__ == "__main__":
    input_size = 16
    output_size = 4
    batch = 8

    key = jax.random.PRNGKey(0)
    k_x, k1, k2, k3, k4 = jax.random.split(key, 5)

    x = jax.random.normal(k_x, (batch, input_size), dtype=jnp.float32)

    params = [
        init_linear(k1, input_size, 32),
        init_linear(k2, 32, 64),
        init_linear(k3, 64, 32),
        init_linear(k4, 32, output_size),
    ]

    out = neural_network_modular(x, params)
    out = jax.block_until_ready(out)
    assert out.shape == (batch, output_size)

    # Strict check vs a plain-JAX emulation of the kernel's bf16 math.
    ref_bf16 = _reference_bf16(x, params)
    assert jnp.allclose(out, ref_bf16, atol=5e-3, rtol=0), \
        f"max abs err vs bf16 ref: {jnp.max(jnp.abs(out - ref_bf16))}"

    # Loose check vs the original full-f32 forward pass.
    ref_f32 = _reference_f32(x, params)
    assert jnp.allclose(out, ref_f32, atol=5e-2, rtol=0), \
        f"max abs err vs f32 ref: {jnp.max(jnp.abs(out - ref_f32))}"

    print("KERNEL_OK")
</pallas_src>

<mosaic_0001>
module attributes {stable_mosaic.version = 11 : i64} {
  func.func @mlp_kernel(%arg0: i32, %arg1: memref<8x128xbf16, #tpu.memory_space<vmem>>, %arg2: memref<4x128x128xbf16, #tpu.memory_space<vmem>>, %arg3: memref<4x128xf32, #tpu.memory_space<vmem>>, %arg4: memref<8x128xf32, #tpu.memory_space<vmem>>) attributes {dimension_semantics = [#tpu.dimension_semantics<parallel>], iteration_bounds = array<i64: 1>, scalar_prefetch = 0 : i64, scratch_operands = 0 : i64, tpu.core_type = #tpu.core_type<tc>, window_params = [{transform_indices = @transform_0, window_bounds = array<i64: 8, 128>}, {pipeline_mode = #tpu.pipeline_mode<synchronous>, transform_indices = @transform_1, window_bounds = array<i64: 4, 128, 128>}, {pipeline_mode = #tpu.pipeline_mode<synchronous>, transform_indices = @transform_2, window_bounds = array<i64: 4, 128>}, {transform_indices = @transform_3, window_bounds = array<i64: 8, 128>}]} {
    %c0 = arith.constant 0 : index
    %c0_0 = arith.constant 0 : index
    %0 = vector.load %arg1[%c0, %c0_0] : memref<8x128xbf16, #tpu.memory_space<vmem>>, vector<8x128xbf16>
    %c0_1 = arith.constant 0 : index
    %c0_2 = arith.constant 0 : index
    %c0_3 = arith.constant 0 : index
    %1 = vector.load %arg2[%c0_1, %c0_2, %c0_3] : memref<4x128x128xbf16, #tpu.memory_space<vmem>>, vector<1x128x128xbf16>
    %2 = vector.shape_cast %1 : vector<1x128x128xbf16> to vector<128x128xbf16>
    %cst = arith.constant dense<0.000000e+00> : vector<8x128xf32>
    %3 = tpu.matmul %0, %2, %cst {dimension_numbers = #tpu.dot_dimension_numbers<[1], [0], [0], [1], [0, 0, 1, 1], [], []>} : vector<8x128xbf16>, vector<128x128xbf16>, vector<8x128xf32> -> vector<8x128xf32>
    %c0_4 = arith.constant 0 : index
    %c0_5 = arith.constant 0 : index
    %4 = vector.load %arg3[%c0_4, %c0_5] : memref<4x128xf32, #tpu.memory_space<vmem>>, vector<1x128xf32>
    %5 = vector.broadcast %4 : vector<1x128xf32> to vector<8x128xf32>
    %6 = arith.addf %3, %5 : vector<8x128xf32>
    %cst_6 = arith.constant 0.000000e+00 : f32
    %7 = vector.broadcast %cst_6 : f32 to vector<8x128xf32>
    %8 = arith.maximumf %6, %7 : vector<8x128xf32>
    %9 = arith.truncf %8 : vector<8x128xf32> to vector<8x128xbf16>
    %c1 = arith.constant 1 : index
    %c0_7 = arith.constant 0 : index
    %c0_8 = arith.constant 0 : index
    %10 = vector.load %arg2[%c1, %c0_7, %c0_8] : memref<4x128x128xbf16, #tpu.memory_space<vmem>>, vector<1x128x128xbf16>
    %11 = vector.shape_cast %10 : vector<1x128x128xbf16> to vector<128x128xbf16>
    %cst_9 = arith.constant dense<0.000000e+00> : vector<8x128xf32>
    %12 = tpu.matmul %9, %11, %cst_9 {dimension_numbers = #tpu.dot_dimension_numbers<[1], [0], [0], [1], [0, 0, 1, 1], [], []>} : vector<8x128xbf16>, vector<128x128xbf16>, vector<8x128xf32> -> vector<8x128xf32>
    %c1_10 = arith.constant 1 : index
    %c0_11 = arith.constant 0 : index
    %13 = vector.load %arg3[%c1_10, %c0_11] : memref<4x128xf32, #tpu.memory_space<vmem>>, vector<1x128xf32>
    %14 = vector.broadcast %13 : vector<1x128xf32> to vector<8x128xf32>
    %15 = arith.addf %12, %14 : vector<8x128xf32>
    %cst_12 = arith.constant 0.000000e+00 : f32
    %16 = vector.broadcast %cst_12 : f32 to vector<8x128xf32>
    %17 = arith.maximumf %15, %16 : vector<8x128xf32>
    %18 = arith.truncf %17 : vector<8x128xf32> to vector<8x128xbf16>
    %c2 = arith.constant 2 : index
    %c0_13 = arith.constant 0 : index
    %c0_14 = arith.constant 0 : index
    %19 = vector.load %arg2[%c2, %c0_13, %c0_14] : memref<4x128x128xbf16, #tpu.memory_space<vmem>>, vector<1x128x128xbf16>
    %20 = vector.shape_cast %19 : vector<1x128x128xbf16> to vector<128x128xbf16>
    %cst_15 = arith.constant dense<0.000000e+00> : vector<8x128xf32>
    %21 = tpu.matmul %18, %20, %cst_15 {dimension_numbers = #tpu.dot_dimension_numbers<[1], [0], [0], [1], [0, 0, 1, 1], [], []>} : vector<8x128xbf16>, vector<128x128xbf16>, vector<8x128xf32> -> vector<8x128xf32>
    %c2_16 = arith.constant 2 : index
    %c0_17 = arith.constant 0 : index
    %22 = vector.load %arg3[%c2_16, %c0_17] : memref<4x128xf32, #tpu.memory_space<vmem>>, vector<1x128xf32>
    %23 = vector.broadcast %22 : vector<1x128xf32> to vector<8x128xf32>
    %24 = arith.addf %21, %23 : vector<8x128xf32>
    %cst_18 = arith.constant 0.000000e+00 : f32
    %25 = vector.broadcast %cst_18 : f32 to vector<8x128xf32>
    %26 = arith.maximumf %24, %25 : vector<8x128xf32>
    %27 = arith.truncf %26 : vector<8x128xf32> to vector<8x128xbf16>
    %c3 = arith.constant 3 : index
    %c0_19 = arith.constant 0 : index
    %c0_20 = arith.constant 0 : index
    %28 = vector.load %arg2[%c3, %c0_19, %c0_20] : memref<4x128x128xbf16, #tpu.memory_space<vmem>>, vector<1x128x128xbf16>
    %29 = vector.shape_cast %28 : vector<1x128x128xbf16> to vector<128x128xbf16>
    %cst_21 = arith.constant dense<0.000000e+00> : vector<8x128xf32>
    %30 = tpu.matmul %27, %29, %cst_21 {dimension_numbers = #tpu.dot_dimension_numbers<[1], [0], [0], [1], [0, 0, 1, 1], [], []>} : vector<8x128xbf16>, vector<128x128xbf16>, vector<8x128xf32> -> vector<8x128xf32>
    %c3_22 = arith.constant 3 : index
    %c0_23 = arith.constant 0 : index
    %31 = vector.load %arg3[%c3_22, %c0_23] : memref<4x128xf32, #tpu.memory_space<vmem>>, vector<1x128xf32>
    %32 = vector.broadcast %31 : vector<1x128xf32> to vector<8x128xf32>
    %33 = arith.addf %30, %32 : vector<8x128xf32>
    %34 = arith.negf %33 : vector<8x128xf32>
    %35 = math.exp %34 : vector<8x128xf32>
    %cst_24 = arith.constant 1.000000e+00 : f32
    %36 = vector.broadcast %cst_24 : f32 to vector<8x128xf32>
    %37 = arith.addf %36, %35 : vector<8x128xf32>
    %38 = arith.divf %36, %37 : vector<8x128xf32>
    %cst_25 = arith.constant 4.000000e-01 : f32
    %39 = vector.broadcast %cst_25 : f32 to vector<8x128xf32>
    %40 = arith.subf %38, %39 : vector<8x128xf32>
    %c0_26 = arith.constant 0 : index
    %c0_27 = arith.constant 0 : index
    %41 = vector.load %arg4[%c0_26, %c0_27] : memref<8x128xf32, #tpu.memory_space<vmem>>, vector<8x128xf32>
    tpu.vector_store %arg4[%c0_26, %c0_27], %40 {strides = array<i32>} : memref<8x128xf32, #tpu.memory_space<vmem>>, vector<8x128xf32>,
    return
  }
  func.func @transform_0(%arg0: i32) -> (i32, i32) {
    %c0_i32 = arith.constant 0 : i32
    %c0_i32_0 = arith.constant 0 : i32
    return %arg0, %c0_i32 : i32, i32
  }
  func.func @transform_1(%arg0: i32) -> (i32, i32, i32) {
    %c0_i32 = arith.constant 0 : i32
    %c0_i32_0 = arith.constant 0 : i32
    %c0_i32_1 = arith.constant 0 : i32
    %c0_i32_2 = arith.constant 0 : i32
    return %c0_i32, %c0_i32_0, %c0_i32_1 : i32, i32, i32
  }
  func.func @transform_2(%arg0: i32) -> (i32, i32) {
    %c0_i32 = arith.constant 0 : i32
    %c0_i32_0 = arith.constant 0 : i32
    %c0_i32_1 = arith.constant 0 : i32
    return %c0_i32, %c0_i32_0 : i32, i32
  }
  func.func @transform_3(%arg0: i32) -> (i32, i32) {
    %c0_i32 = arith.constant 0 : i32
    %c0_i32_0 = arith.constant 0 : i32
    return %arg0, %c0_i32 : i32, i32
  }
}

</mosaic_0001>

<bundles_post_ra>
// kernel: neural_network_modular.1
= control target key start
LH: loop header
LB: loop body
LE: loop exit
PB: predicated region body
PF: predicated region fallthrough
CT: control target
= control target key end

     0   :  { %s717_s1 = inlined_call_operand.vmem [shape: bf16[4,128,128], index: 1, kind: input, shape index: {}]   ;;  %s718_s2 = inlined_call_operand.vmem [shape: f32[4,128], index: 2, kind: input, shape index: {}]   ;;  %s719_s0 = inlined_call_operand.vmem [shape: bf16[8,128], index: 0, kind: input, shape index: {}]   ;;  %s720_s3 = inlined_call_operand.vmem [shape: f32[8,128], index: 3, kind: output, shape index: {}]  }
   0x1   :  { %v550_v0 = vld [vmem:[%s717_s1 + $0x38] sm:$0xff]  ;;  %v549_v1 = vld [vmem:[%s717_s1 + $0x30] sm:$0xff]  ;;  %v548_v4 = vld [vmem:[%s717_s1 + $0x28] sm:$0xff] }
   0x2   :  { %81 = vmatpush.bf16.msra.mxu0 %v550_v0  ;;  %v558_v2 = vld [vmem:[%s717_s1 + $0x78] sm:$0xff]  ;;  %v557_v3 = vld [vmem:[%s717_s1 + $0x70] sm:$0xff]  ;;  %v556_v5 = vld [vmem:[%s717_s1 + $0x68] sm:$0xff] }
   0x3   :  { %163 = vmatpush.bf16.msra.mxu1 %v558_v2  ;;  %v547_v6 = vld [vmem:[%s717_s1 + $0x20] sm:$0xff]  ;;  %v546_v8 = vld [vmem:[%s717_s1 + $0x18] sm:$0xff]  ;;  %v545_v10 = vld [vmem:[%s717_s1 + $0x10] sm:$0xff] }
   0x4   :  { %v555_v7 = vld [vmem:[%s717_s1 + $0x60] sm:$0xff]  ;;  %v554_v9 = vld [vmem:[%s717_s1 + $0x58] sm:$0xff]  ;;  %v553_v11 = vld [vmem:[%s717_s1 + $0x50] sm:$0xff] }
   0x5   :  { %v544_v12 = vld [vmem:[%s717_s1 + $0x8] sm:$0xff]  ;;  %v543_v13 = vld [vmem:[%s717_s1] sm:$0xff]  ;;  %v566_v17 = vld [vmem:[%s717_s1 + $0xb8] sm:$0xff] }
   0x6   :  { %82 = vmatpush.bf16.msra.mxu0 %v549_v1  ;;  %v14_v14 = vld [vmem:[%s719_s0] sm:$0xf]  ;;  %v552_v15 = vld [vmem:[%s717_s1 + $0x48] sm:$0xff]  ;;  %245 = vmatpush.bf16.msra.mxu2 %v566_v17  ;;  %v565_v18 = vld [vmem:[%s717_s1 + $0xb0] sm:$0xff] }
   0x7   :  { %164 = vmatpush.bf16.msra.mxu1 %v557_v3  ;;  %v551_v16 = vld [vmem:[%s717_s1 + $0x40] sm:$0xff]  ;;  %v564_v19 = vld [vmem:[%s717_s1 + $0xa8] sm:$0xff]  ;;  %v562_v21 = vld [vmem:[%s717_s1 + $0x98] sm:$0xff] }
   0x8   :  { %v563_v20 = vld [vmem:[%s717_s1 + $0xa0] sm:$0xff]  ;;  %v561_v22 = vld [vmem:[%s717_s1 + $0x90] sm:$0xff]  ;;  %v560_v29 = vld [vmem:[%s717_s1 + $0x88] sm:$0xff] }
   0x9   :  { %v575_v23 = vld [vmem:[%s718_s2] ss:$0 sm:$0xff]  ;;  %v574_v31 = vld [vmem:[%s717_s1 + $0xf8] sm:$0xff]  ;;  %v573_v32 = vld [vmem:[%s717_s1 + $0xf0] sm:$0xff] }
   0xa   :  { %83 = vmatpush.bf16.msra.mxu0 %v548_v4  ;;  %246 = vmatpush.bf16.msra.mxu2 %v565_v18  ;;  %v559_v30 = vld [vmem:[%s717_s1 + $0x80] sm:$0xff]  ;;  %v572_v33 = vld [vmem:[%s717_s1 + $0xe8] sm:$0xff]  ;;  %v570_v35 = vld [vmem:[%s717_s1 + $0xd8] sm:$0xff] }
   0xb   :  { %165 = vmatpush.bf16.msra.mxu1 %v556_v5  ;;  %327 = vmatpush.bf16.msra.mxu3 %v574_v31  ;;  %v571_v34 = vld [vmem:[%s717_s1 + $0xe0] sm:$0xff]  ;;  %v569_v36 = vld [vmem:[%s717_s1 + $0xd0] sm:$0xff]  ;;  %v568_v43 = vld [vmem:[%s717_s1 + $0xc8] sm:$0xff] }
   0xc   :  { %v576_v37 = vld [vmem:[%s718_s2 + $0x1] ss:$0 sm:$0xff]  ;;  %v577_v45 = vld [vmem:[%s718_s2 + $0x2] ss:$0 sm:$0xff]  ;;  %v578_v51 = vld [vmem:[%s718_s2 + $0x3] ss:$0 sm:$0xff] }
   0xd   :  { %v567_v44 = vld [vmem:[%s717_s1 + $0xc0] sm:$0xff] }
   0xe   :  { %84 = vmatpush.bf16.msra.mxu0 %v547_v6  ;;  %247 = vmatpush.bf16.msra.mxu2 %v564_v19 }
   0xf   :  { %166 = vmatpush.bf16.msra.mxu1 %v555_v7  ;;  %328 = vmatpush.bf16.msra.mxu3 %v573_v32 }
  0x12   :  { %85 = vmatpush.bf16.msra.mxu0 %v546_v8  ;;  %248 = vmatpush.bf16.msra.mxu2 %v563_v20 }
  0x13   :  { %167 = vmatpush.bf16.msra.mxu1 %v554_v9  ;;  %329 = vmatpush.bf16.msra.mxu3 %v572_v33 }
  0x16   :  { %86 = vmatpush.bf16.msra.mxu0 %v545_v10  ;;  %249 = vmatpush.bf16.msra.mxu2 %v562_v21 }
  0x17   :  { %168 = vmatpush.bf16.msra.mxu1 %v553_v11  ;;  %330 = vmatpush.bf16.msra.mxu3 %v571_v34 }
  0x1a   :  { %87 = vmatpush.bf16.msra.mxu0 %v544_v12  ;;  %250 = vmatpush.bf16.msra.mxu2 %v561_v22 }
  0x1b   :  { %169 = vmatpush.bf16.msra.mxu1 %v552_v15  ;;  %331 = vmatpush.bf16.msra.mxu3 %v570_v35 }
  0x1e   :  { %88 = vmatpush.bf16.msra.mxu0 %v543_v13  ;;  %251 = vmatpush.bf16.msra.mxu2 %v560_v29 }
  0x1f   :  { %170 = vmatpush.bf16.msra.mxu1 %v551_v16  ;;  %332 = vmatpush.bf16.msra.mxu3 %v569_v36 }
  0x21   :  { %89 = vmatmul.bf16.vlgmr.msra.gmra.mxu0 %v14_v14 }
  0x22   :  { %252 = vmatpush.bf16.msra.mxu2 %v559_v30 }
  0x23   :  { %333 = vmatpush.bf16.msra.mxu3 %v568_v43 }
  0x27   :  { %334 = vmatpush.bf16.msra.mxu3 %v567_v44 }
  0x9e   :  { %v90_v24 = vpop.f32.mrf.mxu0 }
  0x9f   :  { %v91_v25 = vadd.f32 %v575_v23, %v90_v24 }
  0xa1   :  { %v94_v26 = vmax.f32 %v91_v25, 0.0 }
  0xa3   :  { %v95_v27 = vpack.c.bf16 %v94_v26, %v94_v26 }
  0xa5   :  { %171 = vmatmul.bf16.vlgmr.msra.gmra.mxu1 %v95_v27 }
  0xa6   :  { %v92_v28 = vpop.f32.mrf.mxu0 }
 0x122   :  { %v172_v38 = vpop.f32.mrf.mxu1 }
 0x123   :  { %v173_v39 = vadd.f32 %v576_v37, %v172_v38 }
 0x125   :  { %v176_v40 = vmax.f32 %v173_v39, 0.0 }
 0x127   :  { %v177_v41 = vpack.c.bf16 %v176_v40, %v176_v40 }
 0x129   :  { %253 = vmatmul.bf16.vlgmr.msra.gmra.mxu2 %v177_v41 }
 0x12a   :  { %v174_v42 = vpop.f32.mrf.mxu1 }
 0x1ac   :  { %v254_v46 = vpop.f32.mrf.mxu2 }
 0x1ad   :  { %v255_v47 = vadd.f32 %v577_v45, %v254_v46 }
 0x1af   :  { %v258_v48 = vmax.f32 %v255_v47, 0.0 }
 0x1b1   :  { %v259_v49 = vpack.c.bf16 %v258_v48, %v258_v48 }
 0x1b3   :  { %335 = vmatmul.bf16.vlgmr.msra.gmra.mxu3 %v259_v49 }
 0x1b4   :  { %v256_v50 = vpop.f32.mrf.mxu2 }
 0x236   :  { %v336_v52 = vpop.f32.mrf.mxu3 }
 0x237   :  { %v337_v53 = vadd.f32 %v578_v51, %v336_v52 }
 0x239   :  { %v541_v54 = vmul.f32 -1.442695, %v337_v53 }
 0x23b   :  { %579 = vpow2.f32 %v541_v54 }
 0x23e   :  { %v338_v55 = vpop.f32.mrf.mxu3 }
 0x241   :  { %v580_v56 = vpop.eup %579 }
 0x242   :  { %v343_v57 = vadd.f32 1.0, %v580_v56 }
 0x244   :  { %581 = vrcp.f32 %v343_v57  ;;  %v355_v61 = vand.u32 2147483648, %v343_v57  ;;  %v353_v63 = vand.u32 2147483647, %v343_v57  ;;  %vm349_vm1 = vweird.f32 %v343_v57 }
 0x246   :  { %v356_v1 = vor.u32 1.1754944e-38, %v355_v61  ;;  %vm354_vm3 = vcmp.eq.f32.partialorder %v353_v63, 8.507059e+37 }
 0x24a   :  { %v582_v58 = vpop.eup %581 }
 0x24b   :  { %v345_v59 = vmul.f32 %v582_v58, %v343_v57  ;;  %vm350_vm0 = vweird.f32 %v582_v58 }
 0x24c   :  { %vm351_vm2 = vmor %vm349_vm1, %vm350_vm0 }
 0x24d   :  { %v346_v60 = vsub.f32 1.0, %v345_v59 }
 0x24f   :  { %v347_v62 = vmul.f32 %v582_v58, %v346_v60 }
 0x251   :  { %v348_v0 = vadd.f32 %v582_v58, %v347_v62 }
 0x253   :  { %v352_v2 = vsel %vm351_vm2, %v582_v58, %v348_v0 }
 0x254   :  { %v357_v3 = vsel %vm354_vm3, %v356_v1, %v352_v2 }
 0x255   :  { %v542_v4 = vadd.f32 -0.4, %v357_v3 }
 0x257   :  { %360 = vst [vmem:[%s720_s3] sm:$0xff] %v542_v4 }

</bundles_post_ra>
